<compile_context>
chip_gen: v7x
topology: tpu7x:2x2x1
jax: 0.10.0
libtpu: 0.0.40
codegen_flags: <defaults>
</compile_context>

<pallas_src>
import numpy as np
import jax
import jax.numpy as jnp
from jax.experimental import pallas as pl
from jax.experimental.pallas import tpu as pltpu

B = 2
T = 16            # input sequence length (conv "width" axis)
C_IN = 16         # input_size
C_HID = 32        # hidden_size
C_OUT = 32        # output_size
K = 4             # conv kernel size
STRIDE = 2
PAD = 1


def _vmem():
    return pl.BlockSpec(memory_space=pltpu.MemorySpace.VMEM)


def _gather_mats(batch, t_in, t_out, k, stride, pad):
    """G[k] has shape (B*t_out, B*t_in); G[k][b*t_out+p, b*t_in+t] = 1 iff t == stride*p + k - pad.

    Out-of-range taps (the zero padding) simply select nothing -> zero contribution.
    Built once at trace time as a compile-time constant operand.
    """
    g = np.zeros((k, batch * t_out, batch * t_in), np.float32)
    for kk in range(k):
        for b in range(batch):
            for p in range(t_out):
                t = stride * p + kk - pad
                if 0 <= t < t_in:
                    g[kk, b * t_out + p, b * t_in + t] = 1.0
    return jnp.asarray(g)


def _leaky_relu(v, slope=0.2):
    return jnp.where(v > 0, v, slope * v)


# ------------------------------ fused kernel ---------------------------------
def movement_conv_kernel(x_ref, g1_ref, w1_ref, b1_ref,
                         g2_ref, w2_ref, b2_ref,
                         wl_ref, bl_ref, out_ref):
    x = x_ref[...]                                     # (B*T, Cin)
    ktaps = w1_ref.shape[0]

    # ---- Conv1d #1 (k=4, s=2, p=1): 4 tap-wise MXU matmuls, fully unrolled ----
    acc1 = jnp.zeros((g1_ref.shape[1], w1_ref.shape[2]), jnp.float32)
    for k in range(ktaps):
        tap = jnp.dot(g1_ref[k], x, preferred_element_type=jnp.float32)        # (B*T1, Cin)
        acc1 = acc1 + jnp.dot(tap, w1_ref[k], preferred_element_type=jnp.float32)
    # TODO(synk): nn.Dropout(0.2, inplace=True) is stochastic only in training; identity at inference.
    y1 = _leaky_relu(acc1 + b1_ref[...])                                        # (B*T1, Chid)

    # ---- Conv1d #2 (k=4, s=2, p=1) ----
    acc2 = jnp.zeros((g2_ref.shape[1], w2_ref.shape[2]), jnp.float32)
    for k in range(ktaps):
        tap = jnp.dot(g2_ref[k], y1, preferred_element_type=jnp.float32)        # (B*T2, Chid)
        acc2 = acc2 + jnp.dot(tap, w2_ref[k], preferred_element_type=jnp.float32)
    y2 = _leaky_relu(acc2 + b2_ref[...])                                        # (B*T2, Cout)

    # ---- out_net: Linear(Cout, Cout) ----
    out_ref[...] = (jnp.dot(y2, wl_ref[...], preferred_element_type=jnp.float32)
                    + bl_ref[...]).astype(out_ref.dtype)


# --------------------------------- wrapper ------------------------------------
def movement_conv_encoder(params, x):
    bsz, tlen, cin = x.shape
    ktaps, _, _ = params["w1"].shape
    cout = params["w2"].shape[2]
    t1 = (tlen + 2 * PAD - K) // STRIDE + 1
    t2 = (t1 + 2 * PAD - K) // STRIDE + 1

    g1 = _gather_mats(bsz, tlen, t1, ktaps, STRIDE, PAD)
    g2 = _gather_mats(bsz, t1, t2, ktaps, STRIDE, PAD)

    out_flat = pl.pallas_call(
        movement_conv_kernel,
        out_shape=jax.ShapeDtypeStruct((bsz * t2, cout), jnp.float32),
        in_specs=[_vmem()] * 9,
        out_specs=_vmem(),
    )(x.reshape(bsz * tlen, cin),
      g1, params["w1"], params["b1"],
      g2, params["w2"], params["b2"],
      params["wl"], params["bl"])
    return out_flat.reshape(bsz, t2, cout)


# ----------------------------- pure-JAX reference -----------------------------
def reference(torch_params, x):
    def conv1d(v, w, b):      # v (B, T, C); w torch layout (Cout, Cin, K); b (Cout,)
        _, tlen, _ = v.shape
        _, _, k = w.shape
        vp = jnp.pad(v, ((0, 0), (PAD, PAD), (0, 0)))
        tout = (tlen + 2 * PAD - k) // STRIDE + 1
        rows = []
        for p in range(tout):
            win = vp[:, STRIDE * p:STRIDE * p + k, :]               # (B, K, Cin)
            rows.append(jnp.einsum("bkc,ock->bo", win, w) + b)
        return jnp.stack(rows, axis=1)                               # (B, Tout, Cout)

    y = _leaky_relu(conv1d(x, torch_params["conv1_w"], torch_params["conv1_b"]))
    y = _leaky_relu(conv1d(y, torch_params["conv2_w"], torch_params["conv2_b"]))
    return y @ torch_params["lin_w"].T + torch_params["lin_b"]


if __name__ == "__main__":
    key = jax.random.PRNGKey(0)
    ks = jax.random.split(key, 8)

    def xavier_normal(k, shape, fan_in, fan_out):
        std = (2.0 / (fan_in + fan_out)) ** 0.5
        return std * jax.random.normal(k, shape, jnp.float32)

    # PyTorch-layout parameters (Conv1d weight (Cout, Cin, K), Linear weight (out, in));
    # biases zero per init_weight (xavier_normal_ weights, constant_ 0 biases).
    torch_params = {
        "conv1_w": xavier_normal(ks[0], (C_HID, C_IN, K), C_IN * K, C_HID * K),
        "conv1_b": jnp.zeros((C_HID,), jnp.float32),
        "conv2_w": xavier_normal(ks[1], (C_OUT, C_HID, K), C_HID * K, C_OUT * K),
        "conv2_b": jnp.zeros((C_OUT,), jnp.float32),
        "lin_w": xavier_normal(ks[2], (C_OUT, C_OUT), C_OUT, C_OUT),
        "lin_b": jnp.zeros((C_OUT,), jnp.float32),
    }

    # Kernel-layout parameters: conv taps transposed to (K, Cin, Cout); linear stored as (in, out).
    params = {
        "w1": jnp.transpose(torch_params["conv1_w"], (2, 1, 0)),
        "b1": torch_params["conv1_b"].reshape(1, C_HID),
        "w2": jnp.transpose(torch_params["conv2_w"], (2, 1, 0)),
        "b2": torch_params["conv2_b"].reshape(1, C_OUT),
        "wl": torch_params["lin_w"].T,
        "bl": torch_params["lin_b"].reshape(1, C_OUT),
    }

    x = jax.random.normal(ks[3], (B, T, C_IN), jnp.float32)

    out = jax.block_until_ready(movement_conv_encoder(params, x))
    ref = reference(torch_params, x)

    assert out.shape == (B, T // 4, C_OUT), out.shape
    assert jnp.allclose(out, ref, atol=1e-4, rtol=1e-4)
    print("KERNEL_OK")
</pallas_src>

<mosaic_0001>
module attributes {stable_mosaic.version = 11 : i64} {
  func.func @movement_conv_kernel(%arg0: memref<32x16xf32, #tpu.memory_space<vmem>>, %arg1: memref<4x16x32xf32, #tpu.memory_space<vmem>>, %arg2: memref<4x16x32xf32, #tpu.memory_space<vmem>>, %arg3: memref<1x32xf32, #tpu.memory_space<vmem>>, %arg4: memref<4x8x16xf32, #tpu.memory_space<vmem>>, %arg5: memref<4x32x32xf32, #tpu.memory_space<vmem>>, %arg6: memref<1x32xf32, #tpu.memory_space<vmem>>, %arg7: memref<32x32xf32, #tpu.memory_space<vmem>>, %arg8: memref<1x32xf32, #tpu.memory_space<vmem>>, %arg9: memref<8x32xf32, #tpu.memory_space<vmem>>) attributes {dimension_semantics = [], scalar_prefetch = 0 : i64, scratch_operands = 0 : i64, tpu.core_type = #tpu.core_type<tc>} {
    %c0 = arith.constant 0 : index
    %c0_0 = arith.constant 0 : index
    %0 = vector.load %arg0[%c0, %c0_0] : memref<32x16xf32, #tpu.memory_space<vmem>>, vector<32x16xf32>
    %cst = arith.constant 0.000000e+00 : f32
    %1 = vector.broadcast %cst : f32 to vector<16x32xf32>
    %c0_1 = arith.constant 0 : index
    %c0_2 = arith.constant 0 : index
    %c0_3 = arith.constant 0 : index
    %2 = vector.load %arg1[%c0_1, %c0_2, %c0_3] : memref<4x16x32xf32, #tpu.memory_space<vmem>>, vector<1x16x32xf32>
    %3 = vector.shape_cast %2 : vector<1x16x32xf32> to vector<16x32xf32>
    %cst_4 = arith.constant dense<0.000000e+00> : vector<16x16xf32>
    %4 = tpu.matmul %3, %0, %cst_4 {dimension_numbers = #tpu.dot_dimension_numbers<[1], [0], [0], [1], [0, 0, 1, 1], [], []>} : vector<16x32xf32>, vector<32x16xf32>, vector<16x16xf32> -> vector<16x16xf32>
    %c0_5 = arith.constant 0 : index
    %c0_6 = arith.constant 0 : index
    %c0_7 = arith.constant 0 : index
    %5 = vector.load %arg2[%c0_5, %c0_6, %c0_7] : memref<4x16x32xf32, #tpu.memory_space<vmem>>, vector<1x16x32xf32>
    %6 = vector.shape_cast %5 : vector<1x16x32xf32> to vector<16x32xf32>
    %cst_8 = arith.constant dense<0.000000e+00> : vector<16x32xf32>
    %7 = tpu.matmul %4, %6, %cst_8 {dimension_numbers = #tpu.dot_dimension_numbers<[1], [0], [0], [1], [0, 0, 1, 1], [], []>} : vector<16x16xf32>, vector<16x32xf32>, vector<16x32xf32> -> vector<16x32xf32>
    %8 = arith.addf %1, %7 : vector<16x32xf32>
    %c1 = arith.constant 1 : index
    %c0_9 = arith.constant 0 : index
    %c0_10 = arith.constant 0 : index
    %9 = vector.load %arg1[%c1, %c0_9, %c0_10] : memref<4x16x32xf32, #tpu.memory_space<vmem>>, vector<1x16x32xf32>
    %10 = vector.shape_cast %9 : vector<1x16x32xf32> to vector<16x32xf32>
    %cst_11 = arith.constant dense<0.000000e+00> : vector<16x16xf32>
    %11 = tpu.matmul %10, %0, %cst_11 {dimension_numbers = #tpu.dot_dimension_numbers<[1], [0], [0], [1], [0, 0, 1, 1], [], []>} : vector<16x32xf32>, vector<32x16xf32>, vector<16x16xf32> -> vector<16x16xf32>
    %c1_12 = arith.constant 1 : index
    %c0_13 = arith.constant 0 : index
    %c0_14 = arith.constant 0 : index
    %12 = vector.load %arg2[%c1_12, %c0_13, %c0_14] : memref<4x16x32xf32, #tpu.memory_space<vmem>>, vector<1x16x32xf32>
    %13 = vector.shape_cast %12 : vector<1x16x32xf32> to vector<16x32xf32>
    %cst_15 = arith.constant dense<0.000000e+00> : vector<16x32xf32>
    %14 = tpu.matmul %11, %13, %cst_15 {dimension_numbers = #tpu.dot_dimension_numbers<[1], [0], [0], [1], [0, 0, 1, 1], [], []>} : vector<16x16xf32>, vector<16x32xf32>, vector<16x32xf32> -> vector<16x32xf32>
    %15 = arith.addf %8, %14 : vector<16x32xf32>
    %c2 = arith.constant 2 : index
    %c0_16 = arith.constant 0 : index
    %c0_17 = arith.constant 0 : index
    %16 = vector.load %arg1[%c2, %c0_16, %c0_17] : memref<4x16x32xf32, #tpu.memory_space<vmem>>, vector<1x16x32xf32>
    %17 = vector.shape_cast %16 : vector<1x16x32xf32> to vector<16x32xf32>
    %cst_18 = arith.constant dense<0.000000e+00> : vector<16x16xf32>
    %18 = tpu.matmul %17, %0, %cst_18 {dimension_numbers = #tpu.dot_dimension_numbers<[1], [0], [0], [1], [0, 0, 1, 1], [], []>} : vector<16x32xf32>, vector<32x16xf32>, vector<16x16xf32> -> vector<16x16xf32>
    %c2_19 = arith.constant 2 : index
    %c0_20 = arith.constant 0 : index
    %c0_21 = arith.constant 0 : index
    %19 = vector.load %arg2[%c2_19, %c0_20, %c0_21] : memref<4x16x32xf32, #tpu.memory_space<vmem>>, vector<1x16x32xf32>
    %20 = vector.shape_cast %19 : vector<1x16x32xf32> to vector<16x32xf32>
    %cst_22 = arith.constant dense<0.000000e+00> : vector<16x32xf32>
    %21 = tpu.matmul %18, %20, %cst_22 {dimension_numbers = #tpu.dot_dimension_numbers<[1], [0], [0], [1], [0, 0, 1, 1], [], []>} : vector<16x16xf32>, vector<16x32xf32>, vector<16x32xf32> -> vector<16x32xf32>
    %22 = arith.addf %15, %21 : vector<16x32xf32>
    %c3 = arith.constant 3 : index
    %c0_23 = arith.constant 0 : index
    %c0_24 = arith.constant 0 : index
    %23 = vector.load %arg1[%c3, %c0_23, %c0_24] : memref<4x16x32xf32, #tpu.memory_space<vmem>>, vector<1x16x32xf32>
    %24 = vector.shape_cast %23 : vector<1x16x32xf32> to vector<16x32xf32>
    %cst_25 = arith.constant dense<0.000000e+00> : vector<16x16xf32>
    %25 = tpu.matmul %24, %0, %cst_25 {dimension_numbers = #tpu.dot_dimension_numbers<[1], [0], [0], [1], [0, 0, 1, 1], [], []>} : vector<16x32xf32>, vector<32x16xf32>, vector<16x16xf32> -> vector<16x16xf32>
    %c3_26 = arith.constant 3 : index
    %c0_27 = arith.constant 0 : index
    %c0_28 = arith.constant 0 : index
    %26 = vector.load %arg2[%c3_26, %c0_27, %c0_28] : memref<4x16x32xf32, #tpu.memory_space<vmem>>, vector<1x16x32xf32>
    %27 = vector.shape_cast %26 : vector<1x16x32xf32> to vector<16x32xf32>
    %cst_29 = arith.constant dense<0.000000e+00> : vector<16x32xf32>
    %28 = tpu.matmul %25, %27, %cst_29 {dimension_numbers = #tpu.dot_dimension_numbers<[1], [0], [0], [1], [0, 0, 1, 1], [], []>} : vector<16x16xf32>, vector<16x32xf32>, vector<16x32xf32> -> vector<16x32xf32>
    %29 = arith.addf %22, %28 : vector<16x32xf32>
    %c0_30 = arith.constant 0 : index
    %c0_31 = arith.constant 0 : index
    %30 = vector.load %arg3[%c0_30, %c0_31] : memref<1x32xf32, #tpu.memory_space<vmem>>, vector<1x32xf32>
    %31 = vector.broadcast %30 : vector<1x32xf32> to vector<16x32xf32>
    %32 = arith.addf %29, %31 : vector<16x32xf32>
    %cst_32 = arith.constant 0.000000e+00 : f32
    %33 = vector.broadcast %cst_32 : f32 to vector<16x32xf32>
    %34 = arith.cmpf ogt, %32, %33 : vector<16x32xf32>
    %cst_33 = arith.constant 2.000000e-01 : f32
    %35 = vector.broadcast %cst_33 : f32 to vector<16x32xf32>
    %36 = arith.mulf %35, %32 : vector<16x32xf32>
    %37 = arith.select %34, %32, %36 : vector<16x32xi1>, vector<16x32xf32>
    %cst_34 = arith.constant 0.000000e+00 : f32
    %38 = vector.broadcast %cst_34 : f32 to vector<8x32xf32>
    %c0_35 = arith.constant 0 : index
    %c0_36 = arith.constant 0 : index
    %c0_37 = arith.constant 0 : index
    %39 = vector.load %arg4[%c0_35, %c0_36, %c0_37] : memref<4x8x16xf32, #tpu.memory_space<vmem>>, vector<1x8x16xf32>
    %40 = vector.shape_cast %39 : vector<1x8x16xf32> to vector<8x16xf32>
    %cst_38 = arith.constant dense<0.000000e+00> : vector<8x32xf32>
    %41 = tpu.matmul %40, %37, %cst_38 {dimension_numbers = #tpu.dot_dimension_numbers<[1], [0], [0], [1], [0, 0, 1, 1], [], []>} : vector<8x16xf32>, vector<16x32xf32>, vector<8x32xf32> -> vector<8x32xf32>
    %c0_39 = arith.constant 0 : index
    %c0_40 = arith.constant 0 : index
    %c0_41 = arith.constant 0 : index
    %42 = vector.load %arg5[%c0_39, %c0_40, %c0_41] : memref<4x32x32xf32, #tpu.memory_space<vmem>>, vector<1x32x32xf32>
    %43 = vector.shape_cast %42 : vector<1x32x32xf32> to vector<32x32xf32>
    %cst_42 = arith.constant dense<0.000000e+00> : vector<8x32xf32>
    %44 = tpu.matmul %41, %43, %cst_42 {dimension_numbers = #tpu.dot_dimension_numbers<[1], [0], [0], [1], [0, 0, 1, 1], [], []>} : vector<8x32xf32>, vector<32x32xf32>, vector<8x32xf32> -> vector<8x32xf32>
    %45 = arith.addf %38, %44 : vector<8x32xf32>
    %c1_43 = arith.constant 1 : index
    %c0_44 = arith.constant 0 : index
    %c0_45 = arith.constant 0 : index
    %46 = vector.load %arg4[%c1_43, %c0_44, %c0_45] : memref<4x8x16xf32, #tpu.memory_space<vmem>>, vector<1x8x16xf32>
    %47 = vector.shape_cast %46 : vector<1x8x16xf32> to vector<8x16xf32>
    %cst_46 = arith.constant dense<0.000000e+00> : vector<8x32xf32>
    %48 = tpu.matmul %47, %37, %cst_46 {dimension_numbers = #tpu.dot_dimension_numbers<[1], [0], [0], [1], [0, 0, 1, 1], [], []>} : vector<8x16xf32>, vector<16x32xf32>, vector<8x32xf32> -> vector<8x32xf32>
    %c1_47 = arith.constant 1 : index
    %c0_48 = arith.constant 0 : index
    %c0_49 = arith.constant 0 : index
    %49 = vector.load %arg5[%c1_47, %c0_48, %c0_49] : memref<4x32x32xf32, #tpu.memory_space<vmem>>, vector<1x32x32xf32>
    %50 = vector.shape_cast %49 : vector<1x32x32xf32> to vector<32x32xf32>
    %cst_50 = arith.constant dense<0.000000e+00> : vector<8x32xf32>
    %51 = tpu.matmul %48, %50, %cst_50 {dimension_numbers = #tpu.dot_dimension_numbers<[1], [0], [0], [1], [0, 0, 1, 1], [], []>} : vector<8x32xf32>, vector<32x32xf32>, vector<8x32xf32> -> vector<8x32xf32>
    %52 = arith.addf %45, %51 : vector<8x32xf32>
    %c2_51 = arith.constant 2 : index
    %c0_52 = arith.constant 0 : index
    %c0_53 = arith.constant 0 : index
    %53 = vector.load %arg4[%c2_51, %c0_52, %c0_53] : memref<4x8x16xf32, #tpu.memory_space<vmem>>, vector<1x8x16xf32>
    %54 = vector.shape_cast %53 : vector<1x8x16xf32> to vector<8x16xf32>
    %cst_54 = arith.constant dense<0.000000e+00> : vector<8x32xf32>
    %55 = tpu.matmul %54, %37, %cst_54 {dimension_numbers = #tpu.dot_dimension_numbers<[1], [0], [0], [1], [0, 0, 1, 1], [], []>} : vector<8x16xf32>, vector<16x32xf32>, vector<8x32xf32> -> vector<8x32xf32>
    %c2_55 = arith.constant 2 : index
    %c0_56 = arith.constant 0 : index
    %c0_57 = arith.constant 0 : index
    %56 = vector.load %arg5[%c2_55, %c0_56, %c0_57] : memref<4x32x32xf32, #tpu.memory_space<vmem>>, vector<1x32x32xf32>
    %57 = vector.shape_cast %56 : vector<1x32x32xf32> to vector<32x32xf32>
    %cst_58 = arith.constant dense<0.000000e+00> : vector<8x32xf32>
    %58 = tpu.matmul %55, %57, %cst_58 {dimension_numbers = #tpu.dot_dimension_numbers<[1], [0], [0], [1], [0, 0, 1, 1], [], []>} : vector<8x32xf32>, vector<32x32xf32>, vector<8x32xf32> -> vector<8x32xf32>
    %59 = arith.addf %52, %58 : vector<8x32xf32>
    %c3_59 = arith.constant 3 : index
    %c0_60 = arith.constant 0 : index
    %c0_61 = arith.constant 0 : index
    %60 = vector.load %arg4[%c3_59, %c0_60, %c0_61] : memref<4x8x16xf32, #tpu.memory_space<vmem>>, vector<1x8x16xf32>
    %61 = vector.shape_cast %60 : vector<1x8x16xf32> to vector<8x16xf32>
    %cst_62 = arith.constant dense<0.000000e+00> : vector<8x32xf32>
    %62 = tpu.matmul %61, %37, %cst_62 {dimension_numbers = #tpu.dot_dimension_numbers<[1], [0], [0], [1], [0, 0, 1, 1], [], []>} : vector<8x16xf32>, vector<16x32xf32>, vector<8x32xf32> -> vector<8x32xf32>
    %c3_63 = arith.constant 3 : index
    %c0_64 = arith.constant 0 : index
    %c0_65 = arith.constant 0 : index
    %63 = vector.load %arg5[%c3_63, %c0_64, %c0_65] : memref<4x32x32xf32, #tpu.memory_space<vmem>>, vector<1x32x32xf32>
    %64 = vector.shape_cast %63 : vector<1x32x32xf32> to vector<32x32xf32>
    %cst_66 = arith.constant dense<0.000000e+00> : vector<8x32xf32>
    %65 = tpu.matmul %62, %64, %cst_66 {dimension_numbers = #tpu.dot_dimension_numbers<[1], [0], [0], [1], [0, 0, 1, 1], [], []>} : vector<8x32xf32>, vector<32x32xf32>, vector<8x32xf32> -> vector<8x32xf32>
    %66 = arith.addf %59, %65 : vector<8x32xf32>
    %c0_67 = arith.constant 0 : index
    %c0_68 = arith.constant 0 : index
    %67 = vector.load %arg6[%c0_67, %c0_68] : memref<1x32xf32, #tpu.memory_space<vmem>>, vector<1x32xf32>
    %68 = vector.broadcast %67 : vector<1x32xf32> to vector<8x32xf32>
    %69 = arith.addf %66, %68 : vector<8x32xf32>
    %cst_69 = arith.constant 0.000000e+00 : f32
    %70 = vector.broadcast %cst_69 : f32 to vector<8x32xf32>
    %71 = arith.cmpf ogt, %69, %70 : vector<8x32xf32>
    %cst_70 = arith.constant 2.000000e-01 : f32
    %72 = vector.broadcast %cst_70 : f32 to vector<8x32xf32>
    %73 = arith.mulf %72, %69 : vector<8x32xf32>
    %74 = arith.select %71, %69, %73 : vector<8x32xi1>, vector<8x32xf32>
    %c0_71 = arith.constant 0 : index
    %c0_72 = arith.constant 0 : index
    %75 = vector.load %arg7[%c0_71, %c0_72] : memref<32x32xf32, #tpu.memory_space<vmem>>, vector<32x32xf32>
    %cst_73 = arith.constant dense<0.000000e+00> : vector<8x32xf32>
    %76 = tpu.matmul %74, %75, %cst_73 {dimension_numbers = #tpu.dot_dimension_numbers<[1], [0], [0], [1], [0, 0, 1, 1], [], []>} : vector<8x32xf32>, vector<32x32xf32>, vector<8x32xf32> -> vector<8x32xf32>
    %c0_74 = arith.constant 0 : index
    %c0_75 = arith.constant 0 : index
    %77 = vector.load %arg8[%c0_74, %c0_75] : memref<1x32xf32, #tpu.memory_space<vmem>>, vector<1x32xf32>
    %78 = vector.broadcast %77 : vector<1x32xf32> to vector<8x32xf32>
    %79 = arith.addf %76, %78 : vector<8x32xf32>
    %c0_76 = arith.constant 0 : index
    %c0_77 = arith.constant 0 : index
    %80 = vector.load %arg9[%c0_76, %c0_77] : memref<8x32xf32, #tpu.memory_space<vmem>>, vector<8x32xf32>
    tpu.vector_store %arg9[%c0_76, %c0_77], %79 {strides = array<i32>} : memref<8x32xf32, #tpu.memory_space<vmem>>, vector<8x32xf32>,
    return
  }
}

</mosaic_0001>

<bundles_post_ra>
// kernel: tpu_custom_call.1
= control target key start
LH: loop header
LB: loop body
LE: loop exit
PB: predicated region body
PF: predicated region fallthrough
CT: control target
= control target key end

     0   :  { %14 = vsyncpa [#allocation3], 0  ;;  %s2181_s0 = inlined_call_operand.vmem [shape: f32[32,16], index: 0, kind: input, shape index: {}]   ;;  %s2182_s1 = inlined_call_operand.hbm [shape: f32[4,16,32], index: 1, kind: input, shape index: {}]   ;;  %s2183_s2 = inlined_call_operand.hbm [shape: f32[4,16,32], index: 2, kind: input, shape index: {}]   ;;  %s2184_s3 = inlined_call_operand.vmem [shape: f32[1,32], index: 3, kind: input, shape index: {}]   ;;  %s2185_s4 = inlined_call_operand.vmem [shape: f32[4,8,16], index: 4, kind: input, shape index: {}]   ;;  %s2186_s5 = inlined_call_operand.hbm [shape: f32[4,32,32], index: 5, kind: input, shape index: {}]   ;;  %s2187_s6 = inlined_call_operand.vmem [shape: f32[1,32], index: 6, kind: input, shape index: {}]   ;;  %s2188_s7 = inlined_call_operand.vmem [shape: f32[32,32], index: 7, kind: input, shape index: {}]   ;;  %s2189_s8 = inlined_call_operand.vmem [shape: f32[1,32], index: 8, kind: input, shape index: {}]   ;;  %s2190_s9 = inlined_call_operand.hbm [shape: f32[8,32], index: 9, kind: output, shape index: {}]  }
   0x1   :  { %15 = vsyncpa [#allocation6], 0 }
   0x2   :  { %16 = vsyncpa [#allocation4], 0  ;;  %s1955_s30 = smov [#allocation5]   ;;  %s1956_s11 = smov [#allocation2]  }
   0x3   :  { %s36_s10 = sshll.u32 %s1955_s30, 4  ;;  %s24_s12 = sshll.u32 %s1956_s11, 4  ;;  %s37_s10 = int_to_ptr.vmem [resolvable:$true] %s36_s10  ;;  %s2014_s12 = int_to_ptr.vmem [resolvable:$true] %s24_s12 }
   0x4   :  { %s1861_s15 = scalar_lea.hbm %s2183_s2, 1024 }
   0x5   :  { %p1862_p0 = scmp.ne.s32.totalorder %s2183_s2, %s1861_s15  ;;  %p1865_p1 = scmp.lt.u32.totalorder %s1861_s15, %s2183_s2 }
   0x7   :  { %p1867_p2 = pnand %p1865_p1, %p1862_p0 }
   0x9   :  { %1870 = shalt.err (!%p1867_p2)
}
   0xa   :  { %s1871_s20 = scalar_lea.vmem %s37_s10, 1024  ;;  %p1876_p4 = scmp.lt.s32.totalorder %s37_s10, %s37_s10 }
   0xb   :  { %p1872_p3 = scmp.ne.s32.totalorder %s37_s10, %s1871_s20  ;;  %p1877_p5 = scmp.lt.s32.totalorder %s1871_s20, %s1871_s20 }
   0xd   :  { %p1878_p6 = por %p1877_p5, %p1876_p4 }
   0xf   :  { %p1879_p7 = pnand %p1878_p6, %p1872_p3 }
  0x11   :  { %1882 = shalt.err (!%p1879_p7)
}
  0x12   :  { %s1957_s21 = smov 128   ;;  %s1958_s22 = smov 8  }
  0x13   :  { %42 = dma.hbm_to_vmem [thread:$0]  %s2183_s2, 1024, %s37_s10, [#allocation6], %s1957_s21, %s1957_s21, %s1958_s22  }
  0x14   :  { %s1883_s27 = scalar_lea.hbm %s2182_s1, 1024 }
  0x15   :  { %p1884_p8 = scmp.ne.s32.totalorder %s2182_s1, %s1883_s27  ;;  %p1887_p9 = scmp.lt.u32.totalorder %s1883_s27, %s2182_s1 }
  0x17   :  { %p1889_p10 = pnand %p1887_p9, %p1884_p8 }
  0x19   :  { %1892 = shalt.err (!%p1889_p10)
}
  0x1a   :  { %s1893_s13 = scalar_lea.vmem %s2014_s12, 1024  ;;  %p1898_p12 = scmp.lt.s32.totalorder %s2014_s12, %s2014_s12 }
  0x1b   :  { %p1894_p11 = scmp.ne.s32.totalorder %s2014_s12, %s1893_s13  ;;  %p1899_p13 = scmp.lt.s32.totalorder %s1893_s13, %s1893_s13 }
  0x1d   :  { %p1900_p0 = por %p1899_p13, %p1898_p12 }
  0x1f   :  { %p1901_p1 = pnand %p1900_p0, %p1894_p11 }
  0x21   :  { %1904 = shalt.err (!%p1901_p1)
}
  0x22   :  { %30 = dma.hbm_to_vmem [thread:$0]  %s2182_s1, 1024, %s2014_s12, [#allocation3], %s1957_s21, %s1957_s21, %s1958_s22  }
  0x23   :  { %s1959_s14 = smov [#allocation7]   ;;  %s1905_s18 = scalar_lea.hbm %s2186_s5, 2048 }
  0x24   :  { %s52_s15 = sshll.u32 %s1959_s14, 4  ;;  %p1906_p2 = scmp.ne.s32.totalorder %s2186_s5, %s1905_s18  ;;  %s53_s15 = int_to_ptr.vmem [resolvable:$true] %s52_s15 }
  0x25   :  { %p1909_p3 = scmp.lt.u32.totalorder %s1905_s18, %s2186_s5 }
  0x27   :  { %p1911_p4 = pnand %p1909_p3, %p1906_p2 }
  0x29   :  { %1914 = shalt.err (!%p1911_p4)
}
  0x2a   :  { %s1915_s25 = scalar_lea.vmem %s53_s15, 2048  ;;  %p1920_p6 = scmp.lt.s32.totalorder %s53_s15, %s53_s15 }
  0x2b   :  { %p1916_p5 = scmp.ne.s32.totalorder %s53_s15, %s1915_s25  ;;  %p1921_p7 = scmp.lt.s32.totalorder %s1915_s25, %s1915_s25 }
  0x2d   :  { %p1922_p8 = por %p1921_p7, %p1920_p6 }
  0x2f   :  { %p1923_p9 = pnand %p1922_p8, %p1916_p5 }
  0x31   :  { %1926 = shalt.err (!%p1923_p9)
}
  0x32   :  { %58 = dma.hbm_to_vmem [thread:$0]  %s2186_s5, 2048, %s53_s15, [#allocation6], %s1957_s21, %s1957_s21, %s1958_s22  }
  0x33   :  { %1949 = dma.done.wait [#allocation3], 1024  }
  0x34   :  { %1950 = vsyncadd [#allocation3], 4294966272 }
  0x35   :  { %1951 = dma.done.wait [#allocation6], 3072  }
  0x36   :  { %1952 = vsyncadd [#allocation6], 4294964224  ;;  %vm80_vm0 = vcmask 261120   ;;  %v74_v0 = vld [vmem:[%s2181_s0] sm:$0xff]  ;;  %v75_v1 = vld [vmem:[%s2181_s0 + $0x8] sm:$0xff]  ;;  %vm251_vm1 = vcmask 130048  }
  0x37   :  { %v76_v2 = vld [vmem:[%s2181_s0 + $0x10] sm:$0xff]  ;;  %v1756_v3 = vpack.c.bf16 %v75_v1, %v74_v0  ;;  %v77_v4 = vld [vmem:[%s2181_s0 + $0x18] sm:$0xff]  ;;  %v78_v7 = vld [vmem:[#allocation2] sm:$0xff]  ;;  %v1960_v34 = vmov 0.0|0.0   ;;  %vm1961_vm2 = vmmov 0   ;;  %v1962_v35 = vmov 0.0  }
  0x38   :  { %v165_v5 = vld [vmem:[#allocation2 + $0x10] sm:$0xff]  ;;  %v1760_v6 = vpack.c.bf16 %v77_v4, %v76_v2  ;;  %v250_v9 = vld [vmem:[#allocation5 + $0x18] sm:$0xff]  ;;  %1609 = vmatprep.mubr.msk.f32.mxu0 %vm80_vm0, %v78_v7  ;;  %v79_v12 = vld [vmem:[#allocation2 + $0x8] sm:$0xff]  ;;  %s1963_s28 = smov [#allocation8]  }
  0x39   :  { %1620 = vmatprep.mubr.msk.f32.mxu1 %vm80_vm0, %v165_v5  ;;  %1765 = vmatprep.subr.bf16.mxu1 %v1756_v3  ;;  %v249_v8 = vld [vmem:[#allocation5 + $0x10] sm:$0xff]  ;;  %v166_v11 = vld [vmem:[#allocation2 + $0x18] sm:$0xff]  ;;  %v415_v13 = vld [vmem:[#allocation2 + $0x20] sm:$0xff]  ;;  %s1483_s29 = sshll.u32 %s1963_s28, 4  ;;  %s1484_s29 = int_to_ptr.vmem [resolvable:$true] %s1483_s29 }
  0x3a   :  { %1757 = vmatprep.subr.bf16.mxu0 %v1756_v3  ;;  %1767 = vmatpush3.bf16.msra.mxu1 %v1756_v3  ;;  %v1772_v10 = vpack.c.bf16 %v250_v9, %v249_v8  ;;  %v416_v14 = vld [vmem:[#allocation2 + $0x28] sm:$0xff]  ;;  %v585_v15 = vld [vmem:[#allocation2 + $0x30] sm:$0xff]  ;;  %v586_v16 = vld [vmem:[#allocation2 + $0x38] sm:$0xff]  ;;  %p1932_p11 = scmp.lt.s32.totalorder %s1484_s29, %s1484_s29 }
  0x3b   :  { %1759 = vmatpush3.bf16.msra.mxu0 %v1756_v3  ;;  %1769 = vmatprep.subr.bf16.mxu1 %v1760_v6  ;;  %v162_v17 = vld [vmem:[#allocation5] sm:$0xff]  ;;  %v163_v18 = vld [vmem:[#allocation5 + $0x8] sm:$0xff]  ;;  %v669_v27 = vld [vmem:[#allocation5 + $0x30] sm:$0xff] }
  0x3c   :  { %1761 = vmatprep.subr.bf16.mxu0 %v1760_v6  ;;  %v1776_v19 = vpack.c.bf16 %v163_v18, %v162_v17  ;;  %v499_v20 = vld [vmem:[#allocation5 + $0x20] sm:$0xff]  ;;  %v500_v21 = vld [vmem:[#allocation5 + $0x28] sm:$0xff]  ;;  %v670_v28 = vld [vmem:[#allocation5 + $0x38] sm:$0xff] }
  0x3d   :  { %v1788_v26 = vpack.c.bf16 %v500_v21, %v499_v20  ;;  %v1800_v31 = vpack.c.bf16 %v670_v28, %v669_v27  ;;  %v1509_v36 = vld [vmem:[%s2184_s3] ss:$0 sm:$0xff]  ;;  %v924_v46 = vld [vmem:[#allocation7 + $0x28] sm:$0xff]  ;;  %v925_v54 = vld [vmem:[#allocation7 + $0x30] sm:$0xff] }
  0x3e   :  { %1771 = vmatpush3.bf16.msra.mxu1 %v1760_v6  ;;  %v923_v44 = vld [vmem:[#allocation7 + $0x20] sm:$0xff]  ;;  %v844_v48 = vld [vmem:[#allocation7 + $0x8] sm:$0xff]  ;;  %v926_v55 = vld [vmem:[#allocation7 + $0x38] sm:$0xff] }
  0x3f   :  { %1763 = vmatpush3.bf16.msra.mxu0 %v1760_v6  ;;  %1781 = vmatprep.subr.bf16.mxu1 %v1756_v3  ;;  %v843_v47 = vld [vmem:[#allocation7] sm:$0xff]  ;;  %v1511_v50 = vld [vmem:[%s2185_s4 + $0x8] sm:$0xff]  ;;  %v1811_v52 = vpack.c.bf16 %v924_v46, %v923_v44  ;;  %v845_v56 = vld [vmem:[#allocation7 + $0x10] sm:$0xff]  ;;  %v1814_v58 = vpack.c.bf16 %v926_v55, %v925_v54 }
  0x40   :  { %1773 = vmatprep.subr.bf16.mxu0 %v1772_v10  ;;  %v769_v51 = vld [vmem:[%s2185_s4] sm:$0xff]  ;;  %v1817_v53 = vpack.c.bf16 %v844_v48, %v843_v47  ;;  %v846_v57 = vld [vmem:[#allocation7 + $0x18] sm:$0xff]  ;;  %v1150_v61 = vld [vmem:[#allocation7 + $0x48] sm:$0xff] }
  0x41   :  { %1621 = vmatmul.mubr.msk.f32.vlgmr.msra.gmra.mrb[0].mxu1 %vm80_vm0, %v166_v11  ;;  %v1820_v59 = vpack.c.bf16 %v846_v57, %v845_v56  ;;  %v1149_v60 = vld [vmem:[#allocation7 + $0x40] sm:$0xff]  ;;  %v1518_v4 = vld [vmem:[%s2185_s4 + $0x18] sm:$0xff]  ;;  %v1151_v5 = vld [vmem:[#allocation7 + $0x50] sm:$0xff] }
  0x42   :  { %1610 = vmatmul.mubr.msk.f32.vlgmr.msra.gmra.mrb[0].mxu0 %vm80_vm0, %v79_v12  ;;  %1783 = vmatpush3.bf16.msra.mxu1 %v1756_v3  ;;  %v1826_v62 = vpack.c.bf16 %v1150_v61, %v1149_v60  ;;  %v1303_v7 = vld [vmem:[#allocation7 + $0x60] sm:$0xff]  ;;  %v1304_v9 = vld [vmem:[#allocation7 + $0x68] sm:$0xff]  ;;  %v1305_v11 = vld [vmem:[#allocation7 + $0x70] sm:$0xff] }
  0x43   :  { %1645 = vmatprep.mubr.msk.f32.mxu1 %vm80_vm0, %v415_v13  ;;  %1785 = vmatprep.subr.bf16.mxu1 %v1760_v6  ;;  %v1306_v12 = vld [vmem:[#allocation7 + $0x78] sm:$0xff] }
  0x44   :  { %1775 = vmatpush3.bf16.msra.mxu0 %v1772_v10  ;;  %v1835_v10 = vpack.c.bf16 %v1304_v9, %v1303_v7  ;;  %v1838_v13 = vpack.c.bf16 %v1306_v12, %v1305_v11  ;;  %v1395_v27 = vld [vmem:[%s2188_s7 + $0x18] sm:$0xff] }
  0x45   :  { %1777 = vmatprep.subr.bf16.mxu0 %v1776_v19 }
  0x46   :  { %1787 = vmatpush3.bf16.msra.mxu1 %v1760_v6 }
  0x47   :  { %1793 = vmatprep.subr.bf16.mxu1 %v1756_v3 }
  0x49   :  { %1646 = vmatmul.mubr.msk.f32.vlgmr.msra.gmra.mrb[2].mxu1 %vm80_vm0, %v416_v14 }
  0x4a   :  { %1795 = vmatpush3.bf16.msra.mxu1 %v1756_v3  ;;  %1663 = vmatprep.mubr.msk.f32.mxu1 %vm80_vm0, %v585_v15  ;;  %v1515_v3 = vld [vmem:[%s2185_s4 + $0x10] sm:$0xff] }
  0x4b   :  { %1797 = vmatprep.subr.bf16.mxu1 %v1760_v6 }
  0x4e   :  { %1799 = vmatpush3.bf16.msra.mxu1 %v1760_v6  ;;  %v1152_v6 = vld [vmem:[#allocation7 + $0x58] sm:$0xff] }
  0x4f   :  { %1807 = vmatprep.subr.bf16.mxu1 %v1960_v34  ;;  %v1829_v8 = vpack.c.bf16 %v1152_v6, %v1151_v5 }
  0x51   :  { %1664 = vmatmul.mubr.msk.f32.vlgmr.msra.gmra.mrb[4].mxu1 %vm80_vm0, %v586_v16 }
  0x52   :  { %1684 = vmatprep.mubr.msk.f32.mxu1 %vm1961_vm2, %v1962_v35 }
 0x114   :  { %v1622_v22 = vpop.f32.mrb[0].mxu1 }
 0x115   :  { %v1611_v23 = vpop.f32.mrb[0].mxu0  ;;  %v239_v24 = vpop.f32.mrb[1].mxu1 }
 0x116   :  { %v153_v25 = vpop.f32.mrb[1].mxu0  ;;  %1627 = vmatprep.mubr.msk.f32.mxu0 %vm251_vm1, %v239_v24  ;;  %v1393_v24 = vld [vmem:[%s2188_s7 + $0x8] sm:$0xff] }
 0x117   :  { %1628 = vmatmul.mubr.msk.f32.vlgmr.msra.gmra.mrb[2].mxu0 %vm251_vm1, %v1622_v22 }
 0x118   :  { %1779 = vmatpush3.bf16.msra.mxu0 %v1776_v19  ;;  %1634 = vmatprep.mubr.msk.f32.mxu0 %vm251_vm1, %v153_v25 }
 0x119   :  { %1789 = vmatprep.subr.bf16.mxu0 %v1788_v26 }
 0x11c   :  { %v1647_v29 = vpop.f32.mrb[2].mxu1 }
 0x11d   :  { %v489_v30 = vpop.f32.mrb[3].mxu1 }
 0x11f   :  { %1635 = vmatmul.mubr.msk.f32.vlgmr.msra.gmra.mrb[2].mxu0 %vm251_vm1, %v1611_v23  ;;  %v1392_v23 = vld [vmem:[%s2188_s7] sm:$0xff] }
 0x120   :  { %1791 = vmatpush3.bf16.msra.mxu0 %v1788_v26  ;;  %1652 = vmatprep.mubr.msk.f32.mxu0 %vm251_vm1, %v489_v30  ;;  %v1841_v25 = vpack.c.bf16 %v1393_v24, %v1392_v23  ;;  %v1394_v26 = vld [vmem:[%s2188_s7 + $0x10] sm:$0xff] }
 0x121   :  { %1801 = vmatprep.subr.bf16.mxu0 %v1800_v31  ;;  %v1844_v28 = vpack.c.bf16 %v1395_v27, %v1394_v26 }
 0x124   :  { %v1665_v32 = vpop.f32.mrb[4].mxu1 }
 0x125   :  { %v659_v33 = vpop.f32.mrb[5].mxu1 }
 0x127   :  { %1653 = vmatmul.mubr.msk.f32.vlgmr.msra.gmra.mrb[2].mxu0 %vm251_vm1, %v1647_v29 }
 0x128   :  { %1803 = vmatpush3.bf16.msra.mxu0 %v1800_v31  ;;  %1670 = vmatprep.mubr.msk.f32.mxu0 %vm251_vm1, %v659_v33  ;;  %v1521_v33 = vld [vmem:[%s2187_s6] ss:$0 sm:$0xff]  ;;  %s1927_s6 = scalar_lea.vmem %s1484_s29, 128 }
 0x129   :  { %1804 = vmatprep.subr.bf16.mxu0 %v1960_v34  ;;  %p1928_p10 = scmp.ne.s32.totalorder %s1484_s29, %s1927_s6  ;;  %p1933_p12 = scmp.lt.s32.totalorder %s1927_s6, %s1927_s6 }
 0x12b   :  { %p1934_p13 = por %p1933_p12, %p1932_p11 }
 0x12d   :  { %p1935_p0 = pnand %p1934_p13, %p1928_p10 }
 0x12f   :  { %1671 = vmatmul.mubr.msk.f32.vlgmr.msra.gmra.mrb[2].mxu0 %vm251_vm1, %v1665_v32 }
 0x130   :  { %1677 = vmatprep.mubr.msk.f32.mxu0 %vm1961_vm2, %v1962_v35 }
 0x202   :  { %v1672_v37 = vpop.f32.mrb[2].mxu0 }
 0x203   :  { %v762_v38 = vadd.f32 %v1672_v37, %v1509_v36  ;;  %v743_v39 = vpop.f32.mrb[3].mxu0 }
 0x204   :  { %v761_v40 = vadd.f32 %v1509_v36, %v743_v39  ;;  %v1522_v39 = vld [vmem:[%s2189_s8] ss:$0 sm:$0xff] }
 0x205   :  { %vm764_vm3 = vcmp.gt.f32.partialorder %v762_v38, 0.0  ;;  %v766_v41 = vmul.f32 0.2, %v762_v38 }
 0x206   :  { %vm763_vm4 = vcmp.gt.f32.partialorder %v761_v40, 0.0  ;;  %v765_v42 = vmul.f32 0.2, %v761_v40 }
 0x207   :  { %v768_v43 = vsel %vm764_vm3, %v762_v38, %v766_v41 }
 0x208   :  { %v767_v45 = vsel %vm763_vm4, %v761_v40, %v765_v42 }
 0x209   :  { %v1805_v49 = vpack.c.bf16 %v768_v43, %v767_v45 }
 0x20b   :  { %1806 = vmatpush3.bf16.msra.mxu0 %v1805_v49  ;;  %1809 = vmatpush3.bf16.msra.mxu1 %v1805_v49 }
 0x20c   :  { %1810 = vmatprep.subr.bf16.mxu0 %v1960_v34  ;;  %1816 = vmatprep.subr.bf16.mxu1 %v1960_v34 }
 0x20e   :  { %1685 = vmatmul.mubr.msk.f32.vlgmr.msra.gmra.mrb[6].mxu1 %vm251_vm1, %v1511_v50  ;;  %1678 = vmatmul.mubr.msk.f32.vlgmr.msra.gmra.mrb[4].mxu0 %vm251_vm1, %v769_v51 }
 0x20f   :  { %1812 = vmatpush3.bf16.msra.mxu0 %v1811_v52  ;;  %1818 = vmatpush3.bf16.msra.mxu1 %v1817_v53 }
 0x210   :  { %1813 = vmatprep.subr.bf16.mxu0 %v1960_v34  ;;  %1819 = vmatprep.subr.bf16.mxu1 %v1960_v34 }
 0x211   :  { %1695 = vmatprep.mubr.msk.f32.mxu0 %vm1961_vm2, %v1962_v35  ;;  %1706 = vmatprep.mubr.msk.f32.mxu1 %vm1961_vm2, %v1962_v35 }
 0x213   :  { %1815 = vmatpush3.bf16.msra.mxu0 %v1814_v58  ;;  %1821 = vmatpush3.bf16.msra.mxu1 %v1820_v59 }
 0x214   :  { %1822 = vmatprep.subr.bf16.mxu0 %v1960_v34  ;;  %1825 = vmatprep.subr.bf16.mxu1 %v1960_v34 }
 0x2e1   :  { %v918_v63 = vpop.f32.mrb[6].mxu1  ;;  %v839_v0 = vpop.f32.mrb[4].mxu0 }
 0x2e2   :  { %v1686_v1 = vpop.f32.mrb[7].mxu1  ;;  %1696 = vmatmul.mubr.msk.f32.vlgmr.msra.gmra.mrb[6].mxu0 %vm80_vm0, %v918_v63  ;;  %1707 = vmatmul.mubr.msk.f32.vlgmr.msra.gmra.mrb[8].mxu1 %vm80_vm0, %v839_v0  ;;  %v1679_v2 = vpop.f32.mrb[5].mxu0 }
 0x2e3   :  { %1824 = vmatpush3.bf16.msra.mxu0 %v1805_v49  ;;  %1713 = vmatprep.mubr.msk.f32.mxu0 %vm1961_vm2, %v1962_v35 }
 0x2e4   :  { %1831 = vmatprep.subr.bf16.mxu0 %v1960_v34  ;;  %1827 = vmatpush3.bf16.msra.mxu1 %v1826_v62 }
 0x2e5   :  { %1828 = vmatprep.subr.bf16.mxu1 %v1960_v34  ;;  %1724 = vmatprep.mubr.msk.f32.mxu1 %vm1961_vm2, %v1962_v35 }
 0x2e6   :  { %1714 = vmatmul.mubr.msk.f32.vlgmr.msra.gmra.mrb[8].mxu0 %vm251_vm1, %v1515_v3 }
 0x2e7   :  { %1833 = vmatpush3.bf16.msra.mxu0 %v1805_v49  ;;  %1731 = vmatprep.mubr.msk.f32.mxu0 %vm1961_vm2, %v1962_v35 }
 0x2e8   :  { %1834 = vmatprep.subr.bf16.mxu0 %v1960_v34  ;;  %1830 = vmatpush3.bf16.msra.mxu1 %v1829_v8 }
 0x2e9   :  { %1840 = vmatprep.subr.bf16.mxu1 %v1960_v34 }
 0x2ea   :  { %1732 = vmatmul.mubr.msk.f32.vlgmr.msra.gmra.mrb[10].mxu0 %vm251_vm1, %v1518_v4 }
 0x2eb   :  { %1742 = vmatprep.mubr.msk.f32.mxu0 %vm1961_vm2, %v1962_v35  ;;  %1836 = vmatpush3.bf16.msra.mxu0 %v1835_v10 }
 0x2ec   :  { %1837 = vmatprep.subr.bf16.mxu0 %v1960_v34 }
 0x2ef   :  { %1839 = vmatpush3.bf16.msra.mxu0 %v1838_v13 }
 0x3b5   :  { %v996_v14 = vpop.f32.mrb[6].mxu0  ;;  %v1069_v15 = vpop.f32.mrb[8].mxu1 }
 0x3b6   :  { %v1697_v16 = vpop.f32.mrb[7].mxu0  ;;  %v1070_v17 = vadd.f32 %v1069_v15, %v996_v14  ;;  %v1708_v18 = vpop.f32.mrb[9].mxu1 }
 0x3b9   :  { %v1144_v19 = vpop.f32.mrb[8].mxu0 }
 0x3ba   :  { %v1715_v20 = vpop.f32.mrb[9].mxu0  ;;  %1725 = vmatmul.mubr.msk.f32.vlgmr.msra.gmra.mrb[10].mxu1 %vm80_vm0, %v1144_v19 }
 0x3bb   :  { %1753 = vmatprep.mubr.msk.f32.mxu1 %vm1961_vm2, %v1962_v35  ;;  %1842 = vmatpush3.bf16.msra.mxu1 %v1841_v25 }
 0x3bc   :  { %1843 = vmatprep.subr.bf16.mxu1 %v1960_v34 }
 0x3bd   :  { %v1298_v21 = vpop.f32.mrb[10].mxu0 }
 0x3be   :  { %v1733_v22 = vpop.f32.mrb[11].mxu0  ;;  %1743 = vmatmul.mubr.msk.f32.vlgmr.msra.gmra.mrb[12].mxu0 %vm80_vm0, %v1298_v21 }
 0x3bf   :  { %1845 = vmatpush3.bf16.msra.mxu1 %v1844_v28 }
 0x48d   :  { %v1222_v29 = vpop.f32.mrb[10].mxu1 }
 0x48e   :  { %v1226_v30 = vadd.f32 %v1222_v29, %v1070_v17  ;;  %v1726_v31 = vpop.f32.mrb[11].mxu1 }
 0x491   :  { %v1376_v32 = vpop.f32.mrb[12].mxu0 }
 0x492   :  { %v1380_v35 = vadd.f32 %v1376_v32, %v1226_v30  ;;  %v1744_v34 = vpop.f32.mrb[13].mxu0 }
 0x494   :  { %v1388_v36 = vadd.f32 %v1521_v33, %v1380_v35 }
 0x496   :  { %vm1389_vm5 = vcmp.gt.f32.partialorder %v1388_v36, 0.0  ;;  %v1390_v37 = vmul.f32 0.2, %v1388_v36 }
 0x498   :  { %v1391_v38 = vsel %vm1389_vm5, %v1388_v36, %v1390_v37 }
 0x499   :  { %1754 = vmatmul.mubr.msk.f32.vlgmr.msra.gmra.mrb[12].mxu1 %vm80_vm0, %v1391_v38 }
 0x56c   :  { %v1472_v40 = vpop.f32.mrb[12].mxu1 }
 0x56d   :  { %v1473_v41 = vadd.f32 %v1522_v39, %v1472_v40  ;;  %v1755_v42 = vpop.f32.mrb[13].mxu1 }
 0x56f   :  { %1476 = vst.msk [vmem:[#allocation8] sm:$0xff] %vm80_vm0, %v1473_v41 }
 0x570   :  { %1938 = shalt.err (!%p1935_p0)
}
 0x571   :  { %s1939_s13 = scalar_lea.hbm %s2190_s9, 128 }
 0x572   :  { %p1940_p1 = scmp.ne.s32.totalorder %s2190_s9, %s1939_s13  ;;  %p1943_p2 = scmp.lt.u32.totalorder %s1939_s13, %s2190_s9 }
 0x574   :  { %p1945_p3 = pnand %p1943_p2, %p1940_p1 }
 0x576   :  { %1948 = shalt.err (!%p1945_p3)
}
 0x577   :  { %1486 = dma.vmem_to_hbm [thread:$0]  %s1484_s29, 128, %s2190_s9, [#allocation4]  }
 0x578   :  { %1953 = dma.done.wait [#allocation4], 128  }
 0x579   :  { %1954 = vsyncadd [#allocation4], 4294967168 }
 0x57a   :  { %1490 = vsyncpa [#allocation3], 1 }
 0x57b   :  { %1491 = vsyncpa [#allocation6], 1 }
 0x57c   :  { %1492 = vsyncpa [#allocation4], 1 }

</bundles_post_ra>
